<compile_context>
chip_gen: v7x
topology: tpu7x:2x2x1
jax: 0.10.0
libtpu: 0.0.40
codegen_flags: <defaults>
</compile_context>

<pallas_src>
import functools

import jax
import jax.numpy as jnp
from jax import lax
from jax.experimental import pallas as pl
from jax.experimental.pallas import tpu as pltpu

KS = 7            # spatial conv kernel size (nn.Conv2d(2, 1, 7, padding=3))
PAD = KS // 2


def _round_up(x, m):
    return (x + m - 1) // m * m


def _tree_sum(parts):
    """Balanced add tree over a list of equally shaped arrays."""
    parts = list(parts)
    while len(parts) > 1:
        nxt = []
        for i in range(0, len(parts) - 1, 2):
            nxt.append(parts[i] + parts[i + 1])
        if len(parts) % 2:
            nxt.append(parts[-1])
        parts = nxt
    return parts[0]


# --------------------------------------------------------------------------
# Kernel A: channel attention vector
#   global avg/max pool over H*W  ->  shared MLP (1x1 convs, no bias)  ->
#   sigmoid(avg_path + max_path), emitted as a (C, 1) column per image.
# --------------------------------------------------------------------------
def channel_attn_kernel(x_ref, w1t_ref, w2_ref, o_ref, *, bt, inv_hw):
    # x_ref : (bt, C, H*W)  VMEM
    # w1t_ref: (C, Cr)      VMEM   -- first 1x1 conv weight, transposed
    # w2_ref : (C, Cr)      VMEM   -- second 1x1 conv weight
    # o_ref : (bt, C, 1)    VMEM
    w1t = w1t_ref[...]                      # (C, Cr)
    w2 = w2_ref[...]                        # (C, Cr)

    def mlp(col):                           # col: (C, 1)
        h = jnp.sum(w1t * col, axis=0, keepdims=True)      # (1, Cr)
        h = jnp.maximum(h, 0.0)                            # ReLU
        return jnp.sum(w2 * h, axis=1, keepdims=True)      # (C, 1)

    for b in range(bt):
        xb = x_ref[b]                                      # (C, H*W)
        avg_col = jnp.sum(xb, axis=1, keepdims=True) * inv_hw   # (C, 1)
        max_col = jnp.max(xb, axis=1, keepdims=True)             # (C, 1)
        o_ref[b] = jax.nn.sigmoid(mlp(avg_col) + mlp(max_col))   # (C, 1)


# --------------------------------------------------------------------------
# Kernel B: channel scaling + spatial attention (NCHW in / NCHW out)
# --------------------------------------------------------------------------
def spatial_kernel(x_ref, ch_ref, ws_ref, o_ref, pad_ref, *, bt):
    # x_ref : (bt, C, H, W)  VMEM
    # ch_ref: (bt, C, H, 1)  VMEM  -- channel attention, lane-broadcastable
    # ws_ref: (2*KS*KS,)     SMEM  -- 7x7 conv weight, flattened (in-ch major)
    # o_ref : (bt, C, H, W)  VMEM
    # pad_ref: (2, Hp, Wp)   VMEM scratch, zero-padded spatial maps
    _, C, H, W = x_ref.shape
    Hp = pad_ref.shape[1]
    Wp = pad_ref.shape[2]

    # Zero the aligned padded scratch once per grid step (borders stay zero;
    # the interior is overwritten for every image below).
    pad_ref[...] = jnp.zeros((2, Hp, Wp), jnp.float32)

    for b in range(bt):
        # ---- channel scaling, written straight into the output block ----
        xca = x_ref[b] * ch_ref[b]                      # (C,H,W) * (C,H,1)
        o_ref[b] = xca

        # ---- channel mean / max maps: true 2-D (H, W), W on lanes ----
        sp_avg = jnp.sum(xca, axis=0) * (1.0 / C)       # (H, W)
        sp_max = jnp.max(xca, axis=0)                   # (H, W)

        pad_ref[0, PAD:PAD + H, PAD:PAD + W] = sp_avg
        pad_ref[1, PAD:PAD + H, PAD:PAD + W] = sp_max

        # ---- 7x7 conv (2 -> 1 channels) as 98 shifted MACs ----
        # dy-hoisted row bands + 14 independent partial accumulators.
        parts = []
        for ci in range(2):
            for dy in range(KS):
                band = pad_ref[ci, dy:dy + H, :]        # (H, Wp)
                base = ci * KS * KS + dy * KS
                p = ws_ref[base] * band[:, 0:W]
                for dx in range(1, KS):
                    p = p + ws_ref[base + dx] * band[:, dx:dx + W]
                parts.append(p)
        sp_attn = jax.nn.sigmoid(_tree_sum(parts))      # (H, W)

        # ---- final spatial rescale, in place ----
        o_ref[b] = o_ref[b] * sp_attn[None, :, :]


# --------------------------------------------------------------------------
# Wrapper
# --------------------------------------------------------------------------
def _pick_bt(B):
    """Batch elements per grid step: amortize per-step overhead but keep
    at least 2 grid steps so both v7x TensorCores stay busy."""
    for bt in (4, 2):
        if B % bt == 0 and B // bt >= 2:
            return bt
    return 1


def cbam_pallas(x, w1, w2, wsp):
    """x: (B, C, H, W); w1: (Cr, C); w2: (C, Cr); wsp: (1, 2, KS, KS)."""
    B, C, H, W = x.shape
    Cr = w1.shape[0]
    HW = H * W
    bt = _pick_bt(B)

    x = x.astype(jnp.float32)
    w1t = jnp.transpose(w1).astype(jnp.float32)          # (C, Cr)
    w2f = w2.astype(jnp.float32)                         # (C, Cr)
    ws_flat = wsp.reshape(-1).astype(jnp.float32)        # (2*KS*KS,)

    # ---- pass 1: channel attention vector (B, C, 1) ----
    xr = x.reshape(B, C, HW)                             # free (contiguous) view
    ch_col = pl.pallas_call(
        functools.partial(channel_attn_kernel, bt=bt, inv_hw=1.0 / HW),
        out_shape=jax.ShapeDtypeStruct((B, C, 1), jnp.float32),
        grid_spec=pltpu.PrefetchScalarGridSpec(
            num_scalar_prefetch=0,
            grid=(B // bt,),
            in_specs=[
                pl.BlockSpec((bt, C, HW), lambda g: (g, 0, 0)),
                pl.BlockSpec((C, Cr), lambda g: (0, 0)),
                pl.BlockSpec((C, Cr), lambda g: (0, 0)),
            ],
            out_specs=pl.BlockSpec((bt, C, 1), lambda g: (g, 0, 0)),
        ),
        compiler_params=pltpu.CompilerParams(
            dimension_semantics=("parallel",)),
    )(xr, w1t, w2f)

    # ---- tiny glue: lane-broadcastable channel attention (B, C, H, 1) ----
    ch_bh1 = jnp.broadcast_to(ch_col[:, :, None, :], (B, C, H, 1))

    # ---- pass 2: channel scaling + spatial attention ----
    Hp = _round_up(H + 2 * PAD, 8)
    Wp = _round_up(W + 2 * PAD, 128)

    out = pl.pallas_call(
        functools.partial(spatial_kernel, bt=bt),
        out_shape=jax.ShapeDtypeStruct((B, C, H, W), jnp.float32),
        grid_spec=pltpu.PrefetchScalarGridSpec(
            num_scalar_prefetch=0,
            grid=(B // bt,),
            in_specs=[
                pl.BlockSpec((bt, C, H, W), lambda g: (g, 0, 0, 0)),
                pl.BlockSpec((bt, C, H, 1), lambda g: (g, 0, 0, 0)),
                pl.BlockSpec(memory_space=pltpu.MemorySpace.SMEM),
            ],
            out_specs=pl.BlockSpec((bt, C, H, W), lambda g: (g, 0, 0, 0)),
            scratch_shapes=[pltpu.VMEM((2, Hp, Wp), jnp.float32)],
        ),
        compiler_params=pltpu.CompilerParams(
            dimension_semantics=("parallel",)),
    )(x, ch_bh1, ws_flat)

    return out


# --------------------------------------------------------------------------
# Pure-JAX reference mirroring the PyTorch module (NCHW)
# --------------------------------------------------------------------------
def cbam_ref(x, w1, w2, wsp):
    avg = jnp.mean(x, axis=(2, 3))            # (B, C)
    mx = jnp.max(x, axis=(2, 3))              # (B, C)

    def mlp(v):
        return jax.nn.relu(v @ w1.T) @ w2.T

    attn = jax.nn.sigmoid(mlp(avg) + mlp(mx))[:, :, None, None]
    xc = x * attn
    sp = jnp.stack([jnp.mean(xc, axis=1), jnp.max(xc, axis=1)], axis=1)
    conv = lax.conv_general_dilated(
        sp, wsp, window_strides=(1, 1),
        padding=((PAD, PAD), (PAD, PAD)),
        dimension_numbers=("NCHW", "OIHW", "NCHW"))
    return xc * jax.nn.sigmoid(conv)


if __name__ == "__main__":
    B, C, H, W = 2, 32, 16, 16
    REDUCTION = 16
    Cr = C // REDUCTION                        # = 2

    key = jax.random.PRNGKey(0)
    k1, k2, k3, k4 = jax.random.split(key, 4)
    x = jax.random.normal(k1, (B, C, H, W), jnp.float32)
    # deterministic synthetic parameters (shapes from the module __init__)
    w1 = jax.random.normal(k2, (Cr, C), jnp.float32) * 0.2    # Conv2d(C, Cr, 1)
    w2 = jax.random.normal(k3, (C, Cr), jnp.float32) * 0.2    # Conv2d(Cr, C, 1)
    wsp = jax.random.normal(k4, (1, 2, KS, KS), jnp.float32) * 0.2  # Conv2d(2, 1, 7)

    out = jax.block_until_ready(cbam_pallas(x, w1, w2, wsp))
    ref = cbam_ref(x, w1, w2, wsp)

    assert out.shape == x.shape
    err = float(jnp.max(jnp.abs(out - ref)))
    assert jnp.allclose(out, ref, rtol=1e-4, atol=1e-4), f"max abs err {err}"
    print("KERNEL_OK")
</pallas_src>

<mosaic_0001>
module attributes {stable_mosaic.version = 11 : i64} {
  func.func @channel_attn_kernel(%arg0: i32, %arg1: memref<1x32x256xf32, #tpu.memory_space<vmem>>, %arg2: memref<32x2xf32, #tpu.memory_space<vmem>>, %arg3: memref<32x2xf32, #tpu.memory_space<vmem>>, %arg4: memref<1x32x1xf32, #tpu.memory_space<vmem>>) attributes {dimension_semantics = [#tpu.dimension_semantics<parallel>], iteration_bounds = array<i64: 2>, scalar_prefetch = 0 : i64, scratch_operands = 0 : i64, tpu.core_type = #tpu.core_type<tc>, window_params = [{transform_indices = @transform_0, window_bounds = array<i64: 1, 32, 256>}, {pipeline_mode = #tpu.pipeline_mode<synchronous>, transform_indices = @transform_1, window_bounds = array<i64: 32, 2>}, {pipeline_mode = #tpu.pipeline_mode<synchronous>, transform_indices = @transform_2, window_bounds = array<i64: 32, 2>}, {transform_indices = @transform_3, window_bounds = array<i64: 1, 32, 1>}]} {
    %c0 = arith.constant 0 : index
    %c0_0 = arith.constant 0 : index
    %0 = vector.load %arg2[%c0, %c0_0] : memref<32x2xf32, #tpu.memory_space<vmem>>, vector<32x2xf32>
    %c0_1 = arith.constant 0 : index
    %c0_2 = arith.constant 0 : index
    %1 = vector.load %arg3[%c0_1, %c0_2] : memref<32x2xf32, #tpu.memory_space<vmem>>, vector<32x2xf32>
    %c0_3 = arith.constant 0 : index
    %c0_4 = arith.constant 0 : index
    %c0_5 = arith.constant 0 : index
    %2 = vector.load %arg1[%c0_3, %c0_4, %c0_5] : memref<1x32x256xf32, #tpu.memory_space<vmem>>, vector<1x32x256xf32>
    %3 = vector.shape_cast %2 : vector<1x32x256xf32> to vector<32x256xf32>
    %cst = arith.constant dense<0.000000e+00> : vector<32xf32>
    %4 = vector.multi_reduction <add>, %3, %cst [1] : vector<32x256xf32> to vector<32xf32>
    %5 = vector.shape_cast %4 : vector<32xf32> to vector<32x1xf32>
    %cst_6 = arith.constant 3.906250e-03 : f32
    %6 = vector.broadcast %cst_6 : f32 to vector<32x1xf32>
    %7 = arith.mulf %5, %6 : vector<32x1xf32>
    %cst_7 = arith.constant dense<0xFF800000> : vector<32xf32>
    %8 = vector.multi_reduction <maximumf>, %3, %cst_7 [1] : vector<32x256xf32> to vector<32xf32>
    %9 = vector.shape_cast %8 : vector<32xf32> to vector<32x1xf32>
    %10 = vector.broadcast %7 : vector<32x1xf32> to vector<32x2xf32>
    %11 = arith.mulf %0, %10 : vector<32x2xf32>
    %cst_8 = arith.constant dense<0.000000e+00> : vector<2xf32>
    %12 = vector.multi_reduction <add>, %11, %cst_8 [0] : vector<32x2xf32> to vector<2xf32>
    %13 = vector.shape_cast %12 : vector<2xf32> to vector<1x2xf32>
    %cst_9 = arith.constant 0.000000e+00 : f32
    %14 = vector.broadcast %cst_9 : f32 to vector<1x2xf32>
    %15 = arith.maximumf %13, %14 : vector<1x2xf32>
    %16 = vector.broadcast %15 : vector<1x2xf32> to vector<32x2xf32>
    %17 = arith.mulf %1, %16 : vector<32x2xf32>
    %cst_10 = arith.constant dense<0.000000e+00> : vector<32xf32>
    %18 = vector.multi_reduction <add>, %17, %cst_10 [1] : vector<32x2xf32> to vector<32xf32>
    %19 = vector.shape_cast %18 : vector<32xf32> to vector<32x1xf32>
    %20 = vector.broadcast %9 : vector<32x1xf32> to vector<32x2xf32>
    %21 = arith.mulf %0, %20 : vector<32x2xf32>
    %cst_11 = arith.constant dense<0.000000e+00> : vector<2xf32>
    %22 = vector.multi_reduction <add>, %21, %cst_11 [0] : vector<32x2xf32> to vector<2xf32>
    %23 = vector.shape_cast %22 : vector<2xf32> to vector<1x2xf32>
    %cst_12 = arith.constant 0.000000e+00 : f32
    %24 = vector.broadcast %cst_12 : f32 to vector<1x2xf32>
    %25 = arith.maximumf %23, %24 : vector<1x2xf32>
    %26 = vector.broadcast %25 : vector<1x2xf32> to vector<32x2xf32>
    %27 = arith.mulf %1, %26 : vector<32x2xf32>
    %cst_13 = arith.constant dense<0.000000e+00> : vector<32xf32>
    %28 = vector.multi_reduction <add>, %27, %cst_13 [1] : vector<32x2xf32> to vector<32xf32>
    %29 = vector.shape_cast %28 : vector<32xf32> to vector<32x1xf32>
    %30 = arith.addf %19, %29 : vector<32x1xf32>
    %31 = arith.negf %30 : vector<32x1xf32>
    %32 = math.exp %31 : vector<32x1xf32>
    %cst_14 = arith.constant 1.000000e+00 : f32
    %33 = vector.broadcast %cst_14 : f32 to vector<32x1xf32>
    %34 = arith.addf %33, %32 : vector<32x1xf32>
    %35 = arith.divf %33, %34 : vector<32x1xf32>
    %c0_15 = arith.constant 0 : index
    %c0_16 = arith.constant 0 : index
    %c0_17 = arith.constant 0 : index
    %36 = vector.load %arg4[%c0_15, %c0_16, %c0_17] : memref<1x32x1xf32, #tpu.memory_space<vmem>>, vector<1x32x1xf32>
    %37 = vector.shape_cast %36 : vector<1x32x1xf32> to vector<32x1xf32>
    %38 = vector.shape_cast %35 : vector<32x1xf32> to vector<1x32x1xf32>
    tpu.vector_store %arg4[%c0_15, %c0_16, %c0_17], %38 {strides = array<i32>} : memref<1x32x1xf32, #tpu.memory_space<vmem>>, vector<1x32x1xf32>,
    return
  }
  func.func @transform_0(%arg0: i32) -> (i32, i32, i32) {
    %c0_i32 = arith.constant 0 : i32
    %c0_i32_0 = arith.constant 0 : i32
    %c0_i32_1 = arith.constant 0 : i32
    return %arg0, %c0_i32, %c0_i32_0 : i32, i32, i32
  }
  func.func @transform_1(%arg0: i32) -> (i32, i32) {
    %c0_i32 = arith.constant 0 : i32
    %c0_i32_0 = arith.constant 0 : i32
    %c0_i32_1 = arith.constant 0 : i32
    return %c0_i32, %c0_i32_0 : i32, i32
  }
  func.func @transform_2(%arg0: i32) -> (i32, i32) {
    %c0_i32 = arith.constant 0 : i32
    %c0_i32_0 = arith.constant 0 : i32
    %c0_i32_1 = arith.constant 0 : i32
    return %c0_i32, %c0_i32_0 : i32, i32
  }
  func.func @transform_3(%arg0: i32) -> (i32, i32, i32) {
    %c0_i32 = arith.constant 0 : i32
    %c0_i32_0 = arith.constant 0 : i32
    %c0_i32_1 = arith.constant 0 : i32
    return %arg0, %c0_i32, %c0_i32_0 : i32, i32, i32
  }
}

</mosaic_0001>

<bundles_post_ra>
// kernel: tpu_custom_call.1
= control target key start
LH: loop header
LB: loop body
LE: loop exit
PB: predicated region body
PF: predicated region fallthrough
CT: control target
= control target key end

     0   :  { %8 = vsyncpa [#allocation3], 0  ;;  %s716_s0 = inlined_call_operand.hbm [shape: f32[2,32,256], index: 0, kind: input, shape index: {}]   ;;  %s717_s1 = inlined_call_operand.vmem [shape: f32[32,2], index: 1, kind: input, shape index: {}]   ;;  %s718_s2 = inlined_call_operand.vmem [shape: f32[32,2], index: 2, kind: input, shape index: {}]   ;;  %s719_s3 = inlined_call_operand.vmem [shape: f32[2,32,1], index: 3, kind: output, shape index: {}]  }
   0x1   :  { %10 = vsyncpa [#allocation3 + $0x1], 0  ;;  %s568_s12 = smov 0   ;;  %s570_s13 = smov 0  }
   0x2   :  { %s572_s14 = smov 0   ;;  %s574_s15 = smov 0  }
   0x3 LB: > { %s587_s16 = sadd.s32 4294967295, %s543_s15   ;;  %s590_s17 = sadd.s32 1, %s543_s15   ;;  %s543_s15 = sphi %s574_s15, %s726_s15   ;;  %s539_s14 = sphi %s572_s14, %s725_s14   ;;  %s535_s13 = sphi %s570_s13, %s724_s13   ;;  %s531_s12 = sphi %s568_s12, %s723_s12  }
   0x4   : > { %s20_s18 = ssub.s32 %s543_s15, %s590_s17  ;;  %s23_s19 = sadd.s32 1, %s539_s14 }
   0x5   : > { %p21_p0 = scmp.eq.s32.totalorder %s20_s18, 0  ;;  %p30_p1 = scmp.ne.s32.totalorder %s539_s14, %s535_s13 }
   0x6   : > { %p31_p2 = scmp.eq.s32.totalorder %s543_s15, 0  ;;  %p36_p3 = scmp.ne.s32.totalorder %s535_s13, %s531_s12 }
   0x7   : > { %s600_s20 = scalar_select %p21_p0, %s539_s14, %s23_s19  }
   0x8   : > { %p32_p4 = por %p31_p2, %p30_p1  ;;  %p37_p5 = scmp.eq.s32.totalorder %s587_s16, 0 }
   0x9   : > { %p428_p6 = scmp.lt.s32.totalorder %s543_s15, 2  ;;  %s134_s22 = sand.u32 1, %s539_s14  }
   0xa   : > { %p604_p7 = por %p37_p5, %p36_p3  ;;  %s407_s23 = sshll.u32 %s134_s22, 6 }
   0xb   : > { %s420_s24 = sshll.u32 %s543_s15, 10  ;;  %s138_s28 = scalar_lea.vmem [#allocation2], %s407_s23 }
   0xc   : > { %s613_s27 = scalar_lea.hbm %s716_s0, %s420_s24  ;;  %s145_s29 = sshll.u32 %s138_s28, 4  ;;  %s615_s29 = int_to_ptr.vmem [resolvable:$true] %s145_s29 }
   0xd   : > { %p617_p8 = pnand %p428_p6, %p32_p4  ;;  %s622_s4 = scalar_lea.sflag [#allocation3], %s134_s22 }
   0xe   : > { %s479_s5 = scalar_lea.hbm %s613_s27, 1024  ;;  %s484_s8 = scalar_lea.hbm %s716_s0, 2048 }
   0xf   : > { %p480_p10 = scmp.ne.s32.totalorder %s613_s27, %s479_s5  ;;  %p481_p11 = pneg %p617_p8 }
  0x10   : > { %p485_p0 = scmp.lt.u32.totalorder %s613_s27, %s716_s0  ;;  %p486_p1 = scmp.lt.u32.totalorder %s484_s8, %s479_s5 }
  0x11   : > { %p482_p12 = pnand %p481_p11, %p480_p10  ;;  %p488_p3 = scmp.lt.u32.totalorder %s479_s5, %s613_s27 }
  0x12   : > { %p487_p2 = por %p486_p1, %p485_p0 }
  0x13   : > { %p483_p13 = pneg %p482_p12 }
  0x14   : > { %p489_p4 = por %p488_p3, %p487_p2 }
  0x16   : > { %p490_p5 = pnand %p489_p4, %p483_p13 }
  0x18   : > { %493 = shalt.err (!%p490_p5)
}
  0x19   : > { %s494_s11 = scalar_lea.vmem %s615_s29, 1024  ;;  %s545_s12 = smov [#allocation2]  }
  0x1a   : > { %p495_p6 = scmp.ne.s32.totalorder %s615_s29, %s494_s11  ;;  %s499_s18 = sshll.u32 %s545_s12, 4  ;;  %s500_s18 = int_to_ptr.vmem [resolvable:$false] %s499_s18 }
  0x1b   : > { %s501_s19 = scalar_lea.vmem %s500_s18, 2048  ;;  %p502_p9 = scmp.lt.s32.totalorder %s615_s29, %s500_s18 }
  0x1c   : > { %p497_p10 = pnand %p495_p6, %p481_p11  ;;  %p503_p0 = scmp.lt.s32.totalorder %s501_s19, %s494_s11 }
  0x1e   : > { %p498_p12 = pneg %p497_p10  ;;  %p504_p1 = por %p503_p0, %p502_p9 }
  0x20   : > { %p505_p2 = pnand %p504_p1, %p498_p12 }
  0x22   : > { %508 = shalt.err (!%p505_p2)
}
  0x23   : > { %s546_s22 = smov 256   ;;  %s547_s23 = smov 16  }
  0x24   : > { %427 = dma.hbm_to_vmem [thread:$0]  (!%p617_p8), %s613_s27, 1024, %s615_s29, %s622_s4, %s546_s22, %s546_s22, %s547_s23  }
  0x25   : > { %p153_p11 = scmp.lt.s32.totalorder %s543_s15, 3  ;;  %p722_p13 = scmp.ge.s32.totalorder %s543_s15, 1 }
  0x27   : > { %p154_p3 = pnand %p722_p13, %p153_p11 }
  0x28   : > { %s159_s24 = sand.u32 (!%p154_p3), 1, %s535_s13  }
  0x29   : > { %157 = sbr.rel (%p154_p3) target bundleno = 415 (0x19f), region = 32  ;;  %s411_s25 = sshll.u32 (!%p154_p3), %s159_s24, 6 }
  0x2a   : > { %s160_s26 = scalar_lea.sflag (!%p154_p3), [#allocation3], %s159_s24  ;;  %s163_s28 = scalar_lea.vmem (!%p154_p3), [#allocation2], %s411_s25 }
  0x30   : > { %526 = dma.done.wait (%p604_p7), %s160_s26, 1024  }
  0x31   : > { %528 = vsyncadd (%p604_p7), %s160_s26, 4294966272  ;;  %v203_v0 = vld [vmem:[%s163_s28 + $0x20] sm:$0xff]  ;;  %v204_v1 = vld [vmem:[%s163_s28 + $0x28] sm:$0xff]  ;;  %vm239_vm0 = vcmask 15360   ;;  %p186_p7 = scmp.lt.s32.totalorder %s587_s16, 1  ;;  %vm332_vm1 = vcmask 7168  }
  0x32   : > { %v199_v2 = vld [vmem:[%s163_s28] sm:$0xff]  ;;  %v213_v3 = vadd.f32 %v204_v1, %v203_v0  ;;  %v200_v4 = vld [vmem:[%s163_s28 + $0x8] sm:$0xff]  ;;  %v201_v5 = vld [vmem:[%s163_s28 + $0x10] sm:$0xff]  ;;  %v229_v15 = vmax.f32 %v203_v0, %v204_v1 }
  0x33   : > { %v202_v6 = vld [vmem:[%s163_s28 + $0x18] sm:$0xff]  ;;  %v207_v7 = vadd.f32 %v200_v4, %v199_v2  ;;  %v223_v8 = vmax.f32 %v199_v2, %v200_v4  ;;  %v205_v10 = vld [vmem:[%s163_s28 + $0x30] sm:$0xff]  ;;  %v191_v19 = vld [vmem:[%s717_s1] sm:$0xff]  ;;  %s728_s16 = smov (!%p186_p7, %s587_s16), 1 }
  0x34   : > { %214 = vadd.xlane.f32.xlu1 %v213_v3  ;;  %v210_v9 = vadd.f32 %v202_v6, %v201_v5  ;;  %v206_v11 = vld [vmem:[%s163_s28 + $0x38] sm:$0xff]  ;;  %v226_v13 = vmax.f32 %v201_v5, %v202_v6  ;;  %v192_v23 = vld [vmem:[%s717_s1 + $0x8] sm:$0xff]  ;;  %v193_v24 = vld [vmem:[%s717_s1 + $0x10] sm:$0xff]  ;;  %s421_s22 = sshll.u32 %s728_s16, 5 }
  0x35   : > { %208 = vadd.xlane.f32.xlu0 %v207_v7  ;;  %v216_v12 = vadd.f32 %v206_v11, %v205_v10  ;;  %v232_v14 = vmax.f32 %v205_v10, %v206_v11  ;;  %v194_v30 = vld [vmem:[%s717_s1 + $0x18] sm:$0xff]  ;;  %v196_v4 = vld [vmem:[%s718_s2 + $0x8] sm:$0xff]  ;;  %v195_v5 = vld [vmem:[%s718_s2] sm:$0xff]  ;;  %s190_s25 = scalar_lea.vmem %s719_s3, %s421_s22 }
  0x38   : > { %224 = vmax.xlane.f32.xlu1 %v223_v8 }
  0x39   : > { %211 = vadd.xlane.f32.xlu0 %v210_v9 }
  0x3c   : > { %217 = vadd.xlane.f32.xlu1 %v216_v12  ;;  %v198_v12 = vld [vmem:[%s718_s2 + $0x18] sm:$0xff] }
  0x3d   : > { %227 = vmax.xlane.f32.xlu0 %v226_v13  ;;  %v197_v13 = vld [vmem:[%s718_s2 + $0x10] sm:$0xff] }
  0x40   : > { %233 = vmax.xlane.f32.xlu1 %v232_v14 }
  0x41   : > { %230 = vmax.xlane.f32.xlu0 %v229_v15 }
  0xc1   : > { %v215_v16 = vpop.xlane.xlu1 %214 }
  0xc2   : > { %v209_v17 = vpop.xlane.xlu0 %208  ;;  %v221_v20 = vmul.f32 0.00390625, %v215_v16 }
  0xc3   : > { %v219_v18 = vmul.f32 0.00390625, %v209_v17 }
  0xc4   : > { %v237_v29 = vmul.f32 %v221_v20, %v193_v24 }
  0xc5   : > { %v225_v21 = vpop.xlane.xlu1 %224  ;;  %v235_v25 = vmul.f32 %v219_v18, %v191_v19 }
  0xc6   : > { %v212_v22 = vpop.xlane.xlu0 %211  ;;  %v270_v34 = vmul.f32 %v225_v21, %v191_v19  ;;  %v243_v40 = vsel %vm239_vm0, %v237_v29, 0.0 }
  0xc7   : > { %v220_v26 = vmul.f32 0.00390625, %v212_v22  ;;  %v240_v33 = vsel %vm239_vm0, %v235_v25, 0.0 }
  0xc8   : > { %v274_v46 = vsel %vm239_vm0, %v270_v34, 0.0 }
  0xc9   : > { %v218_v27 = vpop.xlane.xlu1 %217  ;;  %v236_v28 = vmul.f32 %v220_v26, %v192_v23 }
  0xca   : > { %v222_v31 = vmul.f32 0.00390625, %v218_v27  ;;  %v228_v32 = vpop.xlane.xlu0 %227 }
  0xcb   : > { %v241_v35 = vsel %vm239_vm0, %v236_v28, 0.0  ;;  %v271_v36 = vmul.f32 %v228_v32, %v192_v23 }
  0xcc   : > { %v242_v37 = vadd.f32 %v241_v35, %v240_v33  ;;  %v238_v38 = vmul.f32 %v222_v31, %v194_v30 }
  0xcd   : > { %v275_v39 = vsel %vm239_vm0, %v271_v36, 0.0  ;;  %v234_v41 = vpop.xlane.xlu1 %233 }
  0xce   : > { %v231_v42 = vpop.xlane.xlu0 %230  ;;  %v244_v43 = vadd.f32 %v243_v40, %v242_v37  ;;  %v245_v44 = vsel %vm239_vm0, %v238_v38, 0.0  ;;  %v273_v45 = vmul.f32 %v234_v41, %v194_v30  ;;  %v276_v48 = vadd.f32 %v275_v39, %v274_v46 }
  0xcf   : > { %v272_v47 = vmul.f32 %v231_v42, %v193_v24 }
  0xd0   : > { %v246_v49 = vadd.f32 %v245_v44, %v244_v43  ;;  %v279_v51 = vsel %vm239_vm0, %v273_v45, 0.0 }
  0xd1   : > { %v277_v50 = vsel %vm239_vm0, %v272_v47, 0.0 }
  0xd2   : > { %v278_v52 = vadd.f32 %v277_v50, %v276_v48  ;;  %v247_v53 = vrot.slane %v246_v49, 4 }
  0xd4   : > { %v248_v54 = vadd.f32 %v247_v53, %v246_v49  ;;  %v280_v55 = vadd.f32 %v279_v51, %v278_v52 }
  0xd6   : > { %v249_v56 = vrot.slane %v248_v54, 2  ;;  %v281_v57 = vrot.slane %v280_v55, 4 }
  0xd8   : > { %v250_v58 = vadd.f32 %v249_v56, %v248_v54  ;;  %v282_v59 = vadd.f32 %v281_v57, %v280_v55 }
  0xda   : > { %v251_v60 = vrot.slane %v250_v58, 1  ;;  %v283_v61 = vrot.slane %v282_v59, 2 }
  0xdc   : > { %v284_v62 = vadd.f32 %v283_v61, %v282_v59  ;;  %v252_v0 = vadd.f32 %v251_v60, %v250_v58 }
  0xde   : > { %v285_v63 = vrot.slane %v284_v62, 1  ;;  %v253_v3 = vmax.f32 %v252_v0, 0.0 }
  0xe0   : > { %v286_v1 = vadd.f32 %v285_v63, %v284_v62  ;;  %v255_v10 = vmul.f32 %v253_v3, %v196_v4  ;;  %v254_v11 = vmul.f32 %v253_v3, %v195_v5  ;;  %v257_v16 = vmul.f32 %v253_v3, %v198_v12 }
  0xe1   : > { %v256_v17 = vmul.f32 %v253_v3, %v197_v13 }
  0xe2   : > { %v287_v2 = vmax.f32 %v286_v1, 0.0  ;;  %v261_v14 = vsel %vm239_vm0, %v255_v10, 0.0  ;;  %v258_v15 = vsel %vm239_vm0, %v254_v11, 0.0  ;;  %v267_v18 = vsel %vm239_vm0, %v257_v16, 0.0 }
  0xe3   : > { %v264_v19 = vsel %vm239_vm0, %v256_v17, 0.0 }
  0xe4   : > { %v289_v6 = vmul.f32 %v287_v2, %v196_v4  ;;  %v288_v7 = vmul.f32 %v287_v2, %v195_v5  ;;  %v291_v20 = vmul.f32 %v287_v2, %v198_v12  ;;  %v290_v21 = vmul.f32 %v287_v2, %v197_v13 }
  0xe6   : > { %v295_v8 = vsel %vm239_vm0, %v289_v6, 0.0  ;;  %v292_v9 = vsel %vm239_vm0, %v288_v7, 0.0  ;;  %v301_v22 = vsel %vm239_vm0, %v291_v20, 0.0  ;;  %v298_v23 = vsel %vm239_vm0, %v290_v21, 0.0 }
  0xe7   : > { %296 = vadd.xlane.f32.xlu1 %v295_v8  ;;  %293 = vadd.xlane.f32.xlu0 %v292_v9 }
  0xeb   : > { %262 = vadd.xlane.f32.xlu1 %v261_v14  ;;  %259 = vadd.xlane.f32.xlu0 %v258_v15 }
  0xef   : > { %268 = vadd.xlane.f32.xlu1 %v267_v18  ;;  %265 = vadd.xlane.f32.xlu0 %v264_v19 }
  0xf3   : > { %302 = vadd.xlane.f32.xlu1 %v301_v22  ;;  %299 = vadd.xlane.f32.xlu0 %v298_v23 }
 0x174   : > { %v297_v24 = vpop.xlane.xlu1 %296  ;;  %v294_v25 = vpop.xlane.xlu0 %293 }
 0x178   : > { %v263_v26 = vpop.xlane.xlu1 %262  ;;  %v260_v27 = vpop.xlane.xlu0 %259 }
 0x179   : > { %v305_v28 = vadd.f32 %v297_v24, %v263_v26  ;;  %v304_v29 = vadd.f32 %v294_v25, %v260_v27 }
 0x17b   : > { %v415_v30 = vmul.f32 -1.442695, %v305_v28  ;;  %v414_v31 = vmul.f32 -1.442695, %v304_v29 }
 0x17c   : > { %v269_v32 = vpop.xlane.xlu1 %268  ;;  %v266_v33 = vpop.xlane.xlu0 %265 }
 0x17d   : > { %463 = vpow2.f32 %v415_v30 }
 0x17e   : > { %465 = vpow2.f32 %v414_v31 }
 0x180   : > { %v303_v34 = vpop.xlane.xlu1 %302  ;;  %v300_v35 = vpop.xlane.xlu0 %299 }
 0x181   : > { %v307_v36 = vadd.f32 %v303_v34, %v269_v32  ;;  %v306_v37 = vadd.f32 %v300_v35, %v266_v33 }
 0x183   : > { %v417_v38 = vmul.f32 -1.442695, %v307_v36  ;;  %v416_v39 = vmul.f32 -1.442695, %v306_v37 }
 0x185   : > { %467 = vpow2.f32 %v417_v38 }
 0x186   : > { %469 = vpow2.f32 %v416_v39 }
 0x187   : > { %v464_v40 = vpop.eup %463 }
 0x188   : > { %v466_v41 = vpop.eup %465  ;;  %v321_v42 = vadd.f32 1.0, %v464_v40 }
 0x189   : > { %v320_v43 = vadd.f32 1.0, %v466_v41 }
 0x18a   : > { %471 = vrcp.f32 %v321_v42 }
 0x18b   : > { %473 = vrcp.f32 %v320_v43 }
 0x18f   : > { %v468_v44 = vpop.eup %467 }
 0x190   : > { %v470_v45 = vpop.eup %469  ;;  %v323_v46 = vadd.f32 1.0, %v468_v44 }
 0x191   : > { %v322_v47 = vadd.f32 1.0, %v470_v45 }
 0x192   : > { %475 = vrcp.f32 %v323_v46 }
 0x193   : > { %477 = vrcp.f32 %v322_v47 }
 0x194   : > { %v472_v48 = vpop.eup %471 }
 0x195   : > { %v474_v49 = vpop.eup %473  ;;  %334 = vst.msk [vmem:[%s190_s25 + $0x8] sm:$0xff] %vm332_vm1, %v472_v48 }
 0x196   : > { %333 = vst.msk [vmem:[%s190_s25] sm:$0xff] %vm332_vm1, %v474_v49 }
 0x19c   : > { %v476_v50 = vpop.eup %475 }
 0x19d   : > { %v478_v51 = vpop.eup %477  ;;  %336 = vst.msk [vmem:[%s190_s25 + $0x18] sm:$0xff] %vm332_vm1, %v476_v50 }
 0x19e   : > { %335 = vst.msk [vmem:[%s190_s25 + $0x10] sm:$0xff] %vm332_vm1, %v478_v51 }
 0x19f PF: > { %p13_p8 = scmp.ge.s32.totalorder %s590_s17, 4   ;;  %s723_s12 = smov %s535_s13 }
 0x1a0   : > { %s724_s13 = smov %s539_s14  ;;  %s725_s14 = smov %s600_s20 }
 0x1a1   : > { %s726_s15 = smov %s590_s17  ;;  %15 = sbr.rel (!%p13_p8) target bundleno = 3 (0x3), region = 72 }
 0x1a8   :  { %358 = vsyncpa [#allocation3], 1 }
 0x1a9   :  { %360 = vsyncpa [#allocation3 + $0x1], 1 }

</bundles_post_ra>
